<compile_context>
chip_gen: v6e
topology: v6e:2x2x1
jax: 0.10.0
libtpu: 0.0.40
codegen_flags: <defaults>
</compile_context>

<pallas_src>
import jax
import jax.numpy as jnp
from jax.experimental import pallas as pl
from jax.experimental.pallas import tpu as pltpu

SIGNAL_LENGTH = 320  # as in the reference script
H1, H2, H3 = 128, 32, 1

# Per-row VMEM footprint (bytes), lane-padded to 128-lane granularity:
#   x f32 tile      : 384 lanes (320->384) * 4 B * 2 buffers = 3072
#   x bf16 in-kernel: 384 * 2                                =  768
#   h1 f32 / h1 bf16: 128*4 + 128*2                          =  768
#   h2 f32 (32->128): 128*4                                  =  512
#   z / misc        : ~128*4                                 =  512
#   out tile        : 128 * 4 * 2 buffers                    = 1024
_PER_ROW_BYTES = 3072 + 768 + 768 + 512 + 512 + 1024   # ~6.5 KiB / row
_FIXED_BYTES = 8 << 20                                  # weights, biases, slack
_MAX_TM = 8192


def _round_up(v, m):
    return (v + m - 1) // m * m


def _tile_and_vmem_limit(n):
    """Pick row-tile TM and a scoped-VMEM limit from the chip's VMEM capacity."""
    try:
        vmem_cap = int(pltpu.get_tpu_info().vmem_capacity_bytes)
    except Exception:
        vmem_cap = 64 << 20  # conservative floor (v7x per-TC VMEM)
    budget = (3 * vmem_cap) // 4                      # leave 25% headroom
    tm = (budget - _FIXED_BYTES) // _PER_ROW_BYTES
    tm = max(256, min(_MAX_TM, (tm // 256) * 256))    # multiple of 256 rows
    tm = min(tm, _round_up(n, 256))                   # don't over-tile tiny N
    vmem_limit = min(vmem_cap - (4 << 20),
                     max(32 << 20, tm * _PER_ROW_BYTES + _FIXED_BYTES))
    return tm, int(vmem_limit)


def _mlp_kernel(x_ref, w1_ref, b1_ref, w2_ref, b2_ref, w3_ref, b3_ref, o_ref):
    # x_ref : (TM, L)   f32      w1_ref: (L, 128)  bf16   b1_ref: (1, 128) f32
    # w2_ref: (128, 32) bf16     b2_ref: (1, 32)   f32
    # w3_ref: (1, 32)   f32      b3_ref: (1,)      f32 (SMEM scalar)
    # o_ref : (TM, 1)   f32
    # Cast to bf16 in-kernel (VPU op hidden under the tile DMA) so HBM only
    # ever sees one 4 B/elem read of x.
    x = x_ref[...].astype(jnp.bfloat16)
    h1 = jnp.dot(x, w1_ref[...], preferred_element_type=jnp.float32)
    h1 = jnp.maximum(h1 + b1_ref[...], 0.0)                       # ReLU (VPU)
    h2 = jnp.dot(h1.astype(jnp.bfloat16), w2_ref[...],
                 preferred_element_type=jnp.float32)              # single-pass MXU
    h2 = jnp.maximum(h2 + b2_ref[...], 0.0)                       # ReLU (VPU)
    # Final Linear(32, 1): lane multiply + cross-lane reduce instead of a
    # degenerate 32x1 MXU matmul.
    z = jnp.sum(h2 * w3_ref[...], axis=-1, keepdims=True) + b3_ref[0]
    # Sigmoid via tanh: one EUP op per vreg; bounded output even for the
    # undefined rows of a ragged last tile.
    o_ref[...] = 0.5 * (jnp.tanh(0.5 * z) + 1.0)


def signal_classifier_forward(x, params, *, tm=None):
    """x: (batch, num_signals, signal_length) float32 -> (batch, num_signals)."""
    batch, num_signals, sig_len = x.shape
    n = batch * num_signals

    w1, b1, w2, b2, w3_row, b3 = params

    # x stays in its native dtype (no wrapper-side cast / pad -> no extra HBM
    # passes); only the small weights are pre-cast to bf16.
    x2d = x.reshape(n, sig_len)
    w1_bf16 = w1.astype(jnp.bfloat16)
    w2_bf16 = w2.astype(jnp.bfloat16)

    auto_tm, vmem_limit = _tile_and_vmem_limit(n)
    if tm is None:
        tm = auto_tm
    tm = min(tm, _round_up(n, 256))
    grid = (pl.cdiv(n, tm),)  # ragged last block handled by Pallas

    out = pl.pallas_call(
        _mlp_kernel,
        out_shape=jax.ShapeDtypeStruct((n, H3), jnp.float32),
        grid=grid,
        in_specs=[
            # Streaming row tiles of x (double-buffered by the pipeline).
            pl.BlockSpec((tm, sig_len), lambda i: (i, 0)),
            # Weights / biases: constant index_maps -> fetched once, VMEM-resident.
            pl.BlockSpec((sig_len, H1), lambda i: (0, 0)),
            pl.BlockSpec((1, H1), lambda i: (0, 0)),
            pl.BlockSpec((H1, H2), lambda i: (0, 0)),
            pl.BlockSpec((1, H2), lambda i: (0, 0)),
            pl.BlockSpec((1, H2), lambda i: (0, 0)),
            # Final bias as an SMEM scalar (no padded VMEM tile, no per-step DMA).
            pl.BlockSpec(memory_space=pltpu.SMEM),
        ],
        out_specs=pl.BlockSpec((tm, H3), lambda i: (i, 0)),
        compiler_params=pltpu.CompilerParams(
            dimension_semantics=("parallel",),  # shard row tiles across TCs (v7x)
            vmem_limit_bytes=vmem_limit,
        ),
    )(x2d, w1_bf16, b1, w2_bf16, b2, w3_row, b3)

    return out[:n, 0].reshape(batch, num_signals)


def init_params(key, signal_length):
    """Deterministic init matching PyTorch Linear shapes (stored as (in, out))."""
    ks = jax.random.split(key, 6)

    def linear(kw, kb, fan_in, fan_out):
        bound = 1.0 / jnp.sqrt(jnp.float32(fan_in))
        w = jax.random.uniform(kw, (fan_in, fan_out), jnp.float32, -bound, bound)
        b = jax.random.uniform(kb, (1, fan_out), jnp.float32, -bound, bound)
        return w, b

    w1, b1 = linear(ks[0], ks[1], signal_length, H1)
    # TODO(synk): declared as Linear(64, 32) in the reference (shape bug); fixed to 128 -> 32.
    w2, b2 = linear(ks[2], ks[3], H1, H2)
    w3, b3 = linear(ks[4], ks[5], H2, H3)
    w3_row = w3.T              # (1, 32) row layout for the in-kernel reduction
    b3_s = b3.reshape((1,))    # (1,) SMEM scalar
    return (w1, b1, w2, b2, w3_row, b3_s)


if __name__ == "__main__":
    key = jax.random.PRNGKey(0)
    k_x, k_p = jax.random.split(key)

    batch, num_signals = 2, 8
    x = jax.random.normal(k_x, (batch, num_signals, SIGNAL_LENGTH), jnp.float32)
    params = init_params(k_p, SIGNAL_LENGTH)

    y = signal_classifier_forward(x, params)
    jax.block_until_ready(y)
    assert y.shape == (batch, num_signals)

    # Pure-JAX reference using the same bf16-input / f32-accumulation recipe.
    w1, b1, w2, b2, w3_row, b3 = params
    xr = x.reshape(batch * num_signals, SIGNAL_LENGTH)
    h1 = jnp.maximum(
        jnp.dot(xr.astype(jnp.bfloat16), w1.astype(jnp.bfloat16),
                preferred_element_type=jnp.float32) + b1, 0.0)
    h2 = jnp.maximum(
        jnp.dot(h1.astype(jnp.bfloat16), w2.astype(jnp.bfloat16),
                preferred_element_type=jnp.float32) + b2, 0.0)
    z = jnp.sum(h2 * w3_row, axis=-1, keepdims=True) + b3[0]
    ref = jax.nn.sigmoid(z).reshape(batch, num_signals)

    assert jnp.allclose(y, ref, atol=2e-3), "mismatch vs JAX reference"
    print("KERNEL_OK")
</pallas_src>

<mosaic_0001>
module attributes {stable_mosaic.version = 11 : i64} {
  func.func @_mlp_kernel(%arg0: i32, %arg1: memref<256x320xf32, #tpu.memory_space<vmem>>, %arg2: memref<320x128xbf16, #tpu.memory_space<vmem>>, %arg3: memref<1x128xf32, #tpu.memory_space<vmem>>, %arg4: memref<128x32xbf16, #tpu.memory_space<vmem>>, %arg5: memref<1x32xf32, #tpu.memory_space<vmem>>, %arg6: memref<1x32xf32, #tpu.memory_space<vmem>>, %arg7: memref<1xf32, #tpu.memory_space<smem>>, %arg8: memref<256x1xf32, #tpu.memory_space<vmem>>) attributes {dimension_semantics = [#tpu.dimension_semantics<parallel>], iteration_bounds = array<i64: 1>, scalar_prefetch = 0 : i64, scratch_operands = 0 : i64, tpu.core_type = #tpu.core_type<tc>, window_params = [{transform_indices = @transform_0, window_bounds = array<i64: 256, 320>}, {pipeline_mode = #tpu.pipeline_mode<synchronous>, transform_indices = @transform_1, window_bounds = array<i64: 320, 128>}, {pipeline_mode = #tpu.pipeline_mode<synchronous>, transform_indices = @transform_2, window_bounds = array<i64: 1, 128>}, {pipeline_mode = #tpu.pipeline_mode<synchronous>, transform_indices = @transform_3, window_bounds = array<i64: 128, 32>}, {pipeline_mode = #tpu.pipeline_mode<synchronous>, transform_indices = @transform_4, window_bounds = array<i64: 1, 32>}, {pipeline_mode = #tpu.pipeline_mode<synchronous>, transform_indices = @transform_5, window_bounds = array<i64: 1, 32>}, {transform_indices = @transform_6, window_bounds = array<i64: 1>}, {transform_indices = @transform_7, window_bounds = array<i64: 256, 1>}]} {
    %c0 = arith.constant 0 : index
    %c0_0 = arith.constant 0 : index
    %0 = vector.load %arg1[%c0, %c0_0] : memref<256x320xf32, #tpu.memory_space<vmem>>, vector<256x320xf32>
    %1 = arith.truncf %0 : vector<256x320xf32> to vector<256x320xbf16>
    %c0_1 = arith.constant 0 : index
    %c0_2 = arith.constant 0 : index
    %2 = vector.load %arg2[%c0_1, %c0_2] : memref<320x128xbf16, #tpu.memory_space<vmem>>, vector<320x128xbf16>
    %cst = arith.constant dense<0.000000e+00> : vector<256x128xf32>
    %3 = tpu.matmul %1, %2, %cst {dimension_numbers = #tpu.dot_dimension_numbers<[1], [0], [0], [1], [0, 0, 1, 1], [], []>} : vector<256x320xbf16>, vector<320x128xbf16>, vector<256x128xf32> -> vector<256x128xf32>
    %c0_3 = arith.constant 0 : index
    %c0_4 = arith.constant 0 : index
    %4 = vector.load %arg3[%c0_3, %c0_4] : memref<1x128xf32, #tpu.memory_space<vmem>>, vector<1x128xf32>
    %5 = vector.broadcast %4 : vector<1x128xf32> to vector<256x128xf32>
    %6 = arith.addf %3, %5 : vector<256x128xf32>
    %cst_5 = arith.constant 0.000000e+00 : f32
    %7 = vector.broadcast %cst_5 : f32 to vector<256x128xf32>
    %8 = arith.maximumf %6, %7 : vector<256x128xf32>
    %9 = arith.truncf %8 : vector<256x128xf32> to vector<256x128xbf16>
    %c0_6 = arith.constant 0 : index
    %c0_7 = arith.constant 0 : index
    %10 = vector.load %arg4[%c0_6, %c0_7] : memref<128x32xbf16, #tpu.memory_space<vmem>>, vector<128x32xbf16>
    %cst_8 = arith.constant dense<0.000000e+00> : vector<256x32xf32>
    %11 = tpu.matmul %9, %10, %cst_8 {dimension_numbers = #tpu.dot_dimension_numbers<[1], [0], [0], [1], [0, 0, 1, 1], [], []>} : vector<256x128xbf16>, vector<128x32xbf16>, vector<256x32xf32> -> vector<256x32xf32>
    %c0_9 = arith.constant 0 : index
    %c0_10 = arith.constant 0 : index
    %12 = vector.load %arg5[%c0_9, %c0_10] : memref<1x32xf32, #tpu.memory_space<vmem>>, vector<1x32xf32>
    %13 = vector.broadcast %12 : vector<1x32xf32> to vector<256x32xf32>
    %14 = arith.addf %11, %13 : vector<256x32xf32>
    %cst_11 = arith.constant 0.000000e+00 : f32
    %15 = vector.broadcast %cst_11 : f32 to vector<256x32xf32>
    %16 = arith.maximumf %14, %15 : vector<256x32xf32>
    %c0_12 = arith.constant 0 : index
    %c0_13 = arith.constant 0 : index
    %17 = vector.load %arg6[%c0_12, %c0_13] : memref<1x32xf32, #tpu.memory_space<vmem>>, vector<1x32xf32>
    %18 = vector.broadcast %17 : vector<1x32xf32> to vector<256x32xf32>
    %19 = arith.mulf %16, %18 : vector<256x32xf32>
    %cst_14 = arith.constant dense<0.000000e+00> : vector<256xf32>
    %20 = vector.multi_reduction <add>, %19, %cst_14 [1] : vector<256x32xf32> to vector<256xf32>
    %21 = vector.shape_cast %20 : vector<256xf32> to vector<256x1xf32>
    %c0_15 = arith.constant 0 : index
    %22 = memref.load %arg7[%c0_15] : memref<1xf32, #tpu.memory_space<smem>>
    %23 = vector.broadcast %22 : f32 to vector<256x1xf32>
    %24 = arith.addf %21, %23 : vector<256x1xf32>
    %cst_16 = arith.constant 5.000000e-01 : f32
    %25 = vector.broadcast %cst_16 : f32 to vector<256x1xf32>
    %26 = arith.mulf %25, %24 : vector<256x1xf32>
    %27 = math.tanh %26 : vector<256x1xf32>
    %cst_17 = arith.constant 1.000000e+00 : f32
    %28 = vector.broadcast %cst_17 : f32 to vector<256x1xf32>
    %29 = arith.addf %27, %28 : vector<256x1xf32>
    %cst_18 = arith.constant 5.000000e-01 : f32
    %30 = vector.broadcast %cst_18 : f32 to vector<256x1xf32>
    %31 = arith.mulf %30, %29 : vector<256x1xf32>
    %c0_19 = arith.constant 0 : index
    %c0_20 = arith.constant 0 : index
    %32 = vector.load %arg8[%c0_19, %c0_20] : memref<256x1xf32, #tpu.memory_space<vmem>>, vector<256x1xf32>
    tpu.vector_store %arg8[%c0_19, %c0_20], %31 {strides = array<i32>} : memref<256x1xf32, #tpu.memory_space<vmem>>, vector<256x1xf32>,
    return
  }
  func.func @transform_0(%arg0: i32) -> (i32, i32) {
    %c0_i32 = arith.constant 0 : i32
    %c0_i32_0 = arith.constant 0 : i32
    return %arg0, %c0_i32 : i32, i32
  }
  func.func @transform_1(%arg0: i32) -> (i32, i32) {
    %c0_i32 = arith.constant 0 : i32
    %c0_i32_0 = arith.constant 0 : i32
    %c0_i32_1 = arith.constant 0 : i32
    return %c0_i32, %c0_i32_0 : i32, i32
  }
  func.func @transform_2(%arg0: i32) -> (i32, i32) {
    %c0_i32 = arith.constant 0 : i32
    %c0_i32_0 = arith.constant 0 : i32
    %c0_i32_1 = arith.constant 0 : i32
    return %c0_i32, %c0_i32_0 : i32, i32
  }
  func.func @transform_3(%arg0: i32) -> (i32, i32) {
    %c0_i32 = arith.constant 0 : i32
    %c0_i32_0 = arith.constant 0 : i32
    %c0_i32_1 = arith.constant 0 : i32
    return %c0_i32, %c0_i32_0 : i32, i32
  }
  func.func @transform_4(%arg0: i32) -> (i32, i32) {
    %c0_i32 = arith.constant 0 : i32
    %c0_i32_0 = arith.constant 0 : i32
    %c0_i32_1 = arith.constant 0 : i32
    return %c0_i32, %c0_i32_0 : i32, i32
  }
  func.func @transform_5(%arg0: i32) -> (i32, i32) {
    %c0_i32 = arith.constant 0 : i32
    %c0_i32_0 = arith.constant 0 : i32
    %c0_i32_1 = arith.constant 0 : i32
    return %c0_i32, %c0_i32_0 : i32, i32
  }
  func.func @transform_6(%arg0: i32) -> i32 {
    %c0_i32 = arith.constant 0 : i32
    %c0_i32_0 = arith.constant 0 : i32
    return %c0_i32 : i32
  }
  func.func @transform_7(%arg0: i32) -> (i32, i32) {
    %c0_i32 = arith.constant 0 : i32
    %c0_i32_0 = arith.constant 0 : i32
    return %arg0, %c0_i32 : i32, i32
  }
}

</mosaic_0001>

<bundles_post_ra>
// kernel: tpu_custom_call.1
= control target key start
LH: loop header
LB: loop body
LE: loop exit
PB: predicated region body
PF: predicated region fallthrough
CT: control target
= control target key end

     0   :  { %13 = vsyncpa [#allocation4], 0  ;;  %s1821_s24 = smov [#allocation3]   ;;  %s2383_s0 = inlined_call_operand.vmem [shape: f32[16,320], index: 0, kind: input, shape index: {}]   ;;  %s2384_s1 = inlined_call_operand.hbm [shape: bf16[320,128], index: 1, kind: input, shape index: {}]   ;;  %s2385_s2 = inlined_call_operand.vmem [shape: f32[1,128], index: 2, kind: input, shape index: {}]   ;;  %s2386_s3 = inlined_call_operand.vmem [shape: bf16[128,32], index: 3, kind: input, shape index: {}]   ;;  %s2387_s4 = inlined_call_operand.vmem [shape: f32[1,32], index: 4, kind: input, shape index: {}]   ;;  %s2388_s5 = inlined_call_operand.vmem [shape: f32[1,32], index: 5, kind: input, shape index: {}]   ;;  %s2389_s6 = inlined_call_operand.<no memory space> [shape: f32[1], index: 6, kind: input, shape index: {}]   ;;  %s2390_s7 = inlined_call_operand.vmem [shape: f32[16,1], index: 7, kind: output, shape index: {}]  }
   0x1   :  { %s21_s25 = sshll.u32 %s1821_s24, 4  ;;  %s22_s25 = int_to_ptr.vmem [resolvable:$true] %s21_s25 }
   0x2   :  { %s1807_s26 = scalar_lea.vmem %s22_s25, 2560  ;;  %p1812_p1 = scmp.lt.s32.totalorder %s22_s25, %s22_s25 }
   0x3   :  { %p1808_p0 = scmp.ne.s32.totalorder %s22_s25, %s1807_s26  ;;  %p1813_p2 = scmp.lt.s32.totalorder %s1807_s26, %s1807_s26 }
   0x5   :  { %p1814_p3 = por %p1813_p2, %p1812_p1 }
   0x7   :  { %p1815_p4 = pnand %p1814_p3, %p1808_p0 }
   0x9   :  { %1818 = shalt.err (!%p1815_p4)
}
   0xa   :  { %s1822_s27 = smov 64   ;;  %s1823_s28 = smov 4  }
   0xb   :  { %27 = dma.hbm_to_vmem [thread:$0]  %s2384_s1, 2560, %s22_s25, [#allocation4], %s1822_s27, %s1822_s27, %s1823_s28  }
   0xc   :  { %1819 = dma.done.wait [#allocation4], 2560  }
   0xd   :  { %1820 = vsyncadd [#allocation4], 4294964736  ;;  %v1707_v0 = vld [vmem:[#allocation3 + $0x78] sm:$0xff]   ;;  %v1709_v2 = vld [vmem:[#allocation3 + $0x70] sm:$0xff]   ;;  %vm353_vm0 = vcmask 523264   ;;  %vm1075_vm1 = vcmask 261120  }
   0xe   :  { %v1708_v1 = vld [vmem:[#allocation3 + $0x38] sm:$0xff]   ;;  %1460 = vmatprep.subr.bf16.mxu0 %v1707_v0  ;;  %v1710_v3 = vld [vmem:[#allocation3 + $0x30] sm:$0xff]   ;;  %v1711_v4 = vld [vmem:[#allocation3 + $0x68] sm:$0xff]   ;;  %vm1334_vm2 = vcmask 7168  }
   0xf   :  { %1461 = vmatpush3.bf16.msra.mxu0 %v1708_v1  ;;  %v1712_v5 = vld [vmem:[#allocation3 + $0x28] sm:$0xff]   ;;  %v1713_v6 = vld [vmem:[#allocation3 + $0x60] sm:$0xff]   ;;  %v1718_v8 = vld [vmem:[#allocation3 + $0x98] sm:$0xff]  }
  0x10   :  { %1462 = vmatprep.subr.bf16.mxu0 %v1709_v2  ;;  %v1714_v7 = vld [vmem:[#allocation3 + $0x20] sm:$0xff]   ;;  %v1715_v9 = vld [vmem:[#allocation3 + $0x58] sm:$0xff]   ;;  %1616 = vmatprep.subr.bf16.mxu1 %v1718_v8  ;;  %v1721_v10 = vld [vmem:[#allocation3 + $0x90] sm:$0xff]  }
  0x11   :  { %1617 = vmatpush3.bf16.msra.mxu1 %v1718_v8  ;;  %v1716_v11 = vld [vmem:[#allocation3 + $0x18] sm:$0xff]   ;;  %v1717_v12 = vld [vmem:[#allocation3 + $0x50] sm:$0xff]   ;;  %v1724_v13 = vld [vmem:[#allocation3 + $0x88] sm:$0xff]  }
  0x12   :  { %1618 = vmatprep.subr.bf16.mxu1 %v1721_v10  ;;  %v1719_v14 = vld [vmem:[#allocation3 + $0x10] sm:$0xff]   ;;  %v43_v15 = vld [vmem:[%s2383_s0 + $0x8] sm:$0xff]  ;;  %v46_v16 = vld [vmem:[%s2383_s0 + $0x20] sm:$0xff] }
  0x13   :  { %1463 = vmatpush3.bf16.msra.mxu0 %v1710_v3  ;;  %v1720_v17 = vld [vmem:[#allocation3 + $0x48] sm:$0xff]   ;;  %v139_v18 = vpack.c.bf16 %v46_v16, %v43_v15  ;;  %v1726_v19 = vld [vmem:[#allocation3 + $0x80] sm:$0xff]   ;;  %v44_v20 = vld [vmem:[%s2383_s0 + $0x10] sm:$0xff] }
  0x14   :  { %1464 = vmatprep.subr.bf16.mxu0 %v1711_v4  ;;  %v47_v21 = vld [vmem:[%s2383_s0 + $0x28] sm:$0xff]  ;;  %v50_v23 = vld [vmem:[%s2383_s0 + $0x40] sm:$0xff]  ;;  %v53_v24 = vld [vmem:[%s2383_s0 + $0x58] sm:$0xff] }
  0x15   :  { %1619 = vmatpush3.bf16.msra.mxu1 %v1721_v10  ;;  %434 = vmatprep.mubr.bf16.mxu0 %v139_v18  ;;  %v140_v22 = vpack.c.bf16 %v47_v21, %v44_v20  ;;  %v1722_v25 = vld [vmem:[#allocation3 + $0x8] sm:$0xff]   ;;  %v1723_v26 = vld [vmem:[#allocation3 + $0x40] sm:$0xff]   ;;  %v143_v27 = vpack.c.bf16 %v53_v24, %v50_v23  ;;  %v56_v28 = vld [vmem:[%s2383_s0 + $0x70] sm:$0xff] }
  0x16   :  { %1620 = vmatprep.subr.bf16.mxu1 %v1724_v13  ;;  %v59_v29 = vld [vmem:[%s2383_s0 + $0x88] sm:$0xff]  ;;  %v1725_v31 = vld [vmem:[#allocation3] sm:$0xff]   ;;  %v45_v33 = vld [vmem:[%s2383_s0 + $0x18] sm:$0xff] }
  0x17   :  { %1465 = vmatpush3.bf16.msra.mxu0 %v1712_v5  ;;  %1624 = vmatprep.mubr.msk.bf16.mxu1 %vm353_vm0, %v140_v22  ;;  %v146_v30 = vpack.c.bf16 %v59_v29, %v56_v28  ;;  %v42_v32 = vld [vmem:[%s2383_s0] sm:$0xff]  ;;  %v49_v34 = vld [vmem:[%s2383_s0 + $0x38] sm:$0xff]  ;;  %v52_v35 = vld [vmem:[%s2383_s0 + $0x50] sm:$0xff] }
  0x18   :  { %1466 = vmatprep.subr.bf16.mxu0 %v1713_v6  ;;  %v138_v36 = vpack.c.bf16 %v45_v33, %v42_v32  ;;  %v62_v37 = vld [vmem:[%s2383_s0 + $0xa0] sm:$0xff]  ;;  %v65_v38 = vld [vmem:[%s2383_s0 + $0xb8] sm:$0xff]  ;;  %v142_v39 = vpack.c.bf16 %v52_v35, %v49_v34  ;;  %v68_v40 = vld [vmem:[%s2383_s0 + $0xd0] sm:$0xff] }
  0x19   :  { %1621 = vmatpush3.bf16.msra.mxu1 %v1724_v13  ;;  %v71_v41 = vld [vmem:[%s2383_s0 + $0xe8] sm:$0xff]  ;;  %v149_v42 = vpack.c.bf16 %v65_v38, %v62_v37  ;;  %v48_v44 = vld [vmem:[%s2383_s0 + $0x30] sm:$0xff]  ;;  %v58_v47 = vld [vmem:[%s2383_s0 + $0x80] sm:$0xff] }
  0x1a   :  { %1622 = vmatprep.subr.bf16.mxu1 %v1726_v19  ;;  %v152_v43 = vpack.c.bf16 %v71_v41, %v68_v40  ;;  %v51_v45 = vld [vmem:[%s2383_s0 + $0x48] sm:$0xff]  ;;  %v74_v49 = vld [vmem:[%s2383_s0 + $0x100] sm:$0xff]  ;;  %v77_v50 = vld [vmem:[%s2383_s0 + $0x118] sm:$0xff] }
  0x1b   :  { %1467 = vmatpush3.bf16.msra.mxu0 %v1714_v7  ;;  %v55_v46 = vld [vmem:[%s2383_s0 + $0x68] sm:$0xff]  ;;  %v141_v48 = vpack.c.bf16 %v51_v45, %v48_v44  ;;  %v80_v52 = vld [vmem:[%s2383_s0 + $0x130] sm:$0xff]  ;;  %v155_v54 = vpack.c.bf16 %v77_v50, %v74_v49  ;;  %v54_v56 = vld [vmem:[%s2383_s0 + $0x60] sm:$0xff] }
  0x1c   :  { %1468 = vmatprep.subr.bf16.mxu0 %v1715_v9  ;;  %v145_v51 = vpack.c.bf16 %v58_v47, %v55_v46  ;;  %v83_v53 = vld [vmem:[%s2383_s0 + $0x148] sm:$0xff]  ;;  %v57_v57 = vld [vmem:[%s2383_s0 + $0x78] sm:$0xff]  ;;  %v64_v59 = vld [vmem:[%s2383_s0 + $0xb0] sm:$0xff] }
  0x1d   :  { %1623 = vmatpush3.bf16.msra.mxu1 %v1726_v19  ;;  %v158_v55 = vpack.c.bf16 %v83_v53, %v80_v52  ;;  %v61_v58 = vld [vmem:[%s2383_s0 + $0x98] sm:$0xff]  ;;  %v144_v60 = vpack.c.bf16 %v57_v57, %v54_v56  ;;  %v86_v61 = vld [vmem:[%s2383_s0 + $0x160] sm:$0xff]  ;;  %v92_v0 = vld [vmem:[%s2383_s0 + $0x190] sm:$0xff] }
  0x1e   :  { %v89_v62 = vld [vmem:[%s2383_s0 + $0x178] sm:$0xff]  ;;  %v148_v63 = vpack.c.bf16 %v64_v59, %v61_v58  ;;  %v95_v1 = vld [vmem:[%s2383_s0 + $0x1a8] sm:$0xff]  ;;  %v60_v3 = vld [vmem:[%s2383_s0 + $0x90] sm:$0xff] }
  0x1f   :  { %1469 = vmatpush3.bf16.msra.mxu0 %v1716_v11  ;;  %v161_v2 = vpack.c.bf16 %v89_v62, %v86_v61  ;;  %v164_v4 = vpack.c.bf16 %v95_v1, %v92_v0  ;;  %v63_v5 = vld [vmem:[%s2383_s0 + $0xa8] sm:$0xff]  ;;  %v70_v7 = vld [vmem:[%s2383_s0 + $0xe0] sm:$0xff]  ;;  %v101_v9 = vld [vmem:[%s2383_s0 + $0x1d8] sm:$0xff] }
  0x20   :  { %1470 = vmatprep.subr.bf16.mxu0 %v1717_v12  ;;  %1625 = vmatmul.mubr.msk.bf16.vlgmr.msra.gmra.mxu1 %vm353_vm0, %v143_v27  ;;  %v67_v6 = vld [vmem:[%s2383_s0 + $0xc8] sm:$0xff]  ;;  %v98_v8 = vld [vmem:[%s2383_s0 + $0x1c0] sm:$0xff]  ;;  %v1727_v10 = vld [vmem:[%s2386_s3 + $0x38] sm:$0xff]  }
  0x21   :  { %1628 = vmatprep.mubr.msk.bf16.mxu1 %vm353_vm0, %v146_v30  ;;  %v104_v11 = vld [vmem:[%s2383_s0 + $0x1f0] sm:$0xff]  ;;  %v107_v12 = vld [vmem:[%s2383_s0 + $0x208] sm:$0xff]  ;;  %1656 = vmatprep.subr.bf16.mxu1 %v1727_v10  ;;  %v151_v15 = vpack.c.bf16 %v70_v7, %v67_v6  ;;  %v167_v16 = vpack.c.bf16 %v101_v9, %v98_v8  ;;  %v66_v18 = vld [vmem:[%s2383_s0 + $0xc0] sm:$0xff] }
  0x22   :  { %v1728_v13 = vld [vmem:[%s2386_s3 + $0x30] sm:$0xff]   ;;  %1657 = vmatpush3.bf16.msra.mxu1 %v1727_v10  ;;  %v69_v19 = vld [vmem:[%s2383_s0 + $0xd8] sm:$0xff]  ;;  %v110_v23 = vld [vmem:[%s2383_s0 + $0x220] sm:$0xff] }
  0x23   :  { %1471 = vmatpush3.bf16.msra.mxu0 %v1719_v14  ;;  %v147_v14 = vpack.c.bf16 %v63_v5, %v60_v3  ;;  %1658 = vmatprep.subr.bf16.mxu1 %v1728_v13  ;;  %v73_v20 = vld [vmem:[%s2383_s0 + $0xf8] sm:$0xff]  ;;  %v76_v21 = vld [vmem:[%s2383_s0 + $0x110] sm:$0xff]  ;;  %v150_v22 = vpack.c.bf16 %v69_v19, %v66_v18  ;;  %v119_v27 = vld [vmem:[%s2383_s0 + $0x268] sm:$0xff] }
  0x24   :  { %1472 = vmatprep.subr.bf16.mxu0 %v1720_v17  ;;  %v170_v17 = vpack.c.bf16 %v107_v12, %v104_v11  ;;  %v113_v24 = vld [vmem:[%s2383_s0 + $0x238] sm:$0xff]  ;;  %v72_v30 = vld [vmem:[%s2383_s0 + $0xf0] sm:$0xff]  ;;  %v79_v32 = vld [vmem:[%s2383_s0 + $0x128] sm:$0xff] }
  0x25   :  { %v173_v28 = vpack.c.bf16 %v113_v24, %v110_v23  ;;  %v82_v33 = vld [vmem:[%s2383_s0 + $0x140] sm:$0xff]  ;;  %v128_v38 = vld [vmem:[%s2383_s0 + $0x2b0] sm:$0xff]  ;;  %v85_v44 = vld [vmem:[%s2383_s0 + $0x158] sm:$0xff] }
  0x26   :  { %1659 = vmatpush3.bf16.msra.mxu1 %v1728_v13  ;;  %v122_v35 = vld [vmem:[%s2383_s0 + $0x280] sm:$0xff]  ;;  %v157_v37 = vpack.c.bf16 %v82_v33, %v79_v32  ;;  %v88_v45 = vld [vmem:[%s2383_s0 + $0x170] sm:$0xff]  ;;  %v87_v52 = vld [vmem:[%s2383_s0 + $0x168] sm:$0xff] }
  0x27   :  { %1473 = vmatpush3.bf16.msra.mxu0 %v1722_v25  ;;  %v154_v25 = vpack.c.bf16 %v76_v21, %v73_v20  ;;  %v134_v47 = vld [vmem:[%s2383_s0 + $0x2e0] sm:$0xff]  ;;  %v160_v49 = vpack.c.bf16 %v88_v45, %v85_v44  ;;  %v91_v53 = vld [vmem:[%s2383_s0 + $0x188] sm:$0xff]  ;;  %v93_v58 = vld [vmem:[%s2383_s0 + $0x198] sm:$0xff] }
  0x28   :  { %1474 = vmatprep.subr.bf16.mxu0 %v1723_v26  ;;  %1629 = vmatmul.mubr.msk.bf16.gmra.mxu1 %vm353_vm0, %v149_v42  ;;  %v116_v26 = vld [vmem:[%s2383_s0 + $0x250] sm:$0xff]  ;;  %v78_v42 = vld [vmem:[%s2383_s0 + $0x120] sm:$0xff]  ;;  %v97_v59 = vld [vmem:[%s2383_s0 + $0x1b8] sm:$0xff] }
  0x29   :  { %1632 = vmatprep.mubr.msk.bf16.mxu1 %vm353_vm0, %v152_v43  ;;  %v176_v29 = vpack.c.bf16 %v119_v27, %v116_v26  ;;  %v81_v43 = vld [vmem:[%s2383_s0 + $0x138] sm:$0xff]  ;;  %v90_v57 = vld [vmem:[%s2383_s0 + $0x180] sm:$0xff]  ;;  %v96_v0 = vld [vmem:[%s2383_s0 + $0x1b0] sm:$0xff] }
  0x2a   :  { %v156_v46 = vpack.c.bf16 %v81_v43, %v78_v42  ;;  %v162_v61 = vpack.c.bf16 %v93_v58, %v90_v57  ;;  %v99_v1 = vld [vmem:[%s2383_s0 + $0x1c8] sm:$0xff]  ;;  %v106_v3 = vld [vmem:[%s2383_s0 + $0x200] sm:$0xff]  ;;  %v1731_v7 = vld [vmem:[%s2386_s3 + $0x18] sm:$0xff]  }
  0x2b   :  { %1475 = vmatpush3.bf16.msra.mxu0 %v1725_v31  ;;  %v75_v31 = vld [vmem:[%s2383_s0 + $0x108] sm:$0xff]  ;;  %v165_v5 = vpack.c.bf16 %v99_v1, %v96_v0  ;;  %v102_v8 = vld [vmem:[%s2383_s0 + $0x1e0] sm:$0xff]  ;;  %v105_v9 = vld [vmem:[%s2383_s0 + $0x1f8] sm:$0xff] }
  0x2c   :  { %v153_v34 = vpack.c.bf16 %v75_v31, %v72_v30  ;;  %v109_v10 = vld [vmem:[%s2383_s0 + $0x218] sm:$0xff]  ;;  %v112_v11 = vld [vmem:[%s2383_s0 + $0x230] sm:$0xff]  ;;  %v168_v13 = vpack.c.bf16 %v105_v9, %v102_v8  ;;  %v115_v18 = vld [vmem:[%s2383_s0 + $0x248] sm:$0xff] }
  0x2d   :  { %v1732_v12 = vld [vmem:[%s2386_s3 + $0x10] sm:$0xff]   ;;  %v118_v19 = vld [vmem:[%s2383_s0 + $0x260] sm:$0xff]  ;;  %v117_v24 = vld [vmem:[%s2383_s0 + $0x258] sm:$0xff] }
  0x2e   :  { %435 = vmatmul.mubr.bf16.vlgmr.msra.gmra.mxu0 %v138_v36  ;;  %v125_v36 = vld [vmem:[%s2383_s0 + $0x298] sm:$0xff]  ;;  %v1734_v20 = vld [vmem:[%s2386_s3] sm:$0xff]   ;;  %v124_v26 = vld [vmem:[%s2383_s0 + $0x290] sm:$0xff] }
  0x2f   :  { %442 = vmatprep.mubr.bf16.mxu0 %v142_v39  ;;  %v131_v39 = vld [vmem:[%s2383_s0 + $0x2c8] sm:$0xff]  ;;  %v179_v40 = vpack.c.bf16 %v125_v36, %v122_v35  ;;  %v114_v23 = vld [vmem:[%s2383_s0 + $0x240] sm:$0xff]  ;;  %v129_v36 = vld [vmem:[%s2383_s0 + $0x2b8] sm:$0xff] }
  0x30   :  { %1633 = vmatmul.mubr.msk.bf16.gmra.mxu1 %vm353_vm0, %v155_v54  ;;  %v182_v41 = vpack.c.bf16 %v131_v39, %v128_v38  ;;  %v94_v54 = vld [vmem:[%s2383_s0 + $0x1a0] sm:$0xff]  ;;  %v174_v27 = vpack.c.bf16 %v117_v24, %v114_v23  ;;  %v123_v30 = vld [vmem:[%s2383_s0 + $0x288] sm:$0xff]  ;;  %v136_v38 = vld [vmem:[%s2383_s0 + $0x2f0] sm:$0xff] }
  0x31   :  { %1636 = vmatprep.mubr.msk.bf16.mxu1 %vm353_vm0, %v158_v55  ;;  %v163_v56 = vpack.c.bf16 %v94_v54, %v91_v53  ;;  %v127_v31 = vld [vmem:[%s2383_s0 + $0x2a8] sm:$0xff]  ;;  %v130_v32 = vld [vmem:[%s2383_s0 + $0x2c0] sm:$0xff] }
  0x32   :  { %v126_v35 = vld [vmem:[%s2383_s0 + $0x2a0] sm:$0xff]  ;;  %v135_v42 = vld [vmem:[%s2383_s0 + $0x2e8] sm:$0xff] }
  0x33   :  { %v180_v39 = vpack.c.bf16 %v129_v36, %v126_v35 }
  0x36   :  { %443 = vmatmul.mubr.bf16.gmra.mxu0 %v141_v48  ;;  %v137_v48 = vld [vmem:[%s2383_s0 + $0x2f8] sm:$0xff] }
  0x37   :  { %450 = vmatprep.mubr.bf16.mxu0 %v145_v51  ;;  %v185_v50 = vpack.c.bf16 %v137_v48, %v134_v47  ;;  %v84_v51 = vld [vmem:[%s2383_s0 + $0x150] sm:$0xff]  ;;  %v2198_v48 = vld [vmem:[%s2385_s2] ss:$0 sm:$0xff] }
  0x38   :  { %1637 = vmatmul.mubr.msk.bf16.gmra.mxu1 %vm353_vm0, %v161_v2  ;;  %v159_v55 = vpack.c.bf16 %v87_v52, %v84_v51  ;;  %v103_v2 = vld [vmem:[%s2383_s0 + $0x1e8] sm:$0xff] }
  0x39   :  { %1640 = vmatprep.mubr.msk.bf16.mxu1 %vm353_vm0, %v164_v4  ;;  %v1730_v4 = vld [vmem:[%s2386_s3 + $0x20] sm:$0xff]   ;;  %v169_v6 = vpack.c.bf16 %v106_v3, %v103_v2 }
  0x3e   :  { %451 = vmatmul.mubr.bf16.gmra.mxu0 %v144_v60  ;;  %v100_v60 = vld [vmem:[%s2383_s0 + $0x1d0] sm:$0xff] }
  0x3f   :  { %458 = vmatprep.mubr.bf16.mxu0 %v148_v63  ;;  %v166_v62 = vpack.c.bf16 %v100_v60, %v97_v59  ;;  %v1729_v63 = vld [vmem:[%s2386_s3 + $0x28] sm:$0xff]  }
  0x40   :  { %1641 = vmatmul.mubr.msk.bf16.gmra.mxu1 %vm353_vm0, %v167_v16  ;;  %1660 = vmatprep.subr.bf16.mxu1 %v1729_v63  ;;  %v108_v16 = vld [vmem:[%s2383_s0 + $0x210] sm:$0xff] }
  0x41   :  { %1644 = vmatprep.mubr.msk.bf16.mxu1 %vm353_vm0, %v170_v17  ;;  %1661 = vmatpush3.bf16.msra.mxu1 %v1729_v63  ;;  %v111_v17 = vld [vmem:[%s2383_s0 + $0x228] sm:$0xff] }
  0x42   :  { %1662 = vmatprep.subr.bf16.mxu1 %v1730_v4  ;;  %v171_v21 = vpack.c.bf16 %v111_v17, %v108_v16 }
  0x45   :  { %1663 = vmatpush3.bf16.msra.mxu1 %v1730_v4 }
  0x46   :  { %459 = vmatmul.mubr.bf16.gmra.mxu0 %v147_v14  ;;  %1664 = vmatprep.subr.bf16.mxu1 %v1731_v7  ;;  %v172_v14 = vpack.c.bf16 %v112_v11, %v109_v10 }
  0x47   :  { %466 = vmatprep.mubr.bf16.mxu0 %v151_v15  ;;  %v1733_v15 = vld [vmem:[%s2386_s3 + $0x8] sm:$0xff]  }
  0x48   :  { %1645 = vmatmul.mubr.msk.bf16.gmra.mxu1 %vm353_vm0, %v173_v28 }
  0x49   :  { %1648 = vmatprep.mubr.msk.bf16.mxu1 %vm353_vm0, %v176_v29  ;;  %1665 = vmatpush3.bf16.msra.mxu1 %v1731_v7  ;;  %v120_v29 = vld [vmem:[%s2383_s0 + $0x270] sm:$0xff] }
  0x4a   :  { %1666 = vmatprep.subr.bf16.mxu1 %v1732_v12  ;;  %v177_v33 = vpack.c.bf16 %v123_v30, %v120_v29 }
  0x4d   :  { %1667 = vmatpush3.bf16.msra.mxu1 %v1732_v12 }
  0x4e   :  { %467 = vmatmul.mubr.bf16.gmra.mxu0 %v150_v22  ;;  %1668 = vmatprep.subr.bf16.mxu1 %v1733_v15  ;;  %v175_v22 = vpack.c.bf16 %v118_v19, %v115_v18 }
  0x4f   :  { %474 = vmatprep.mubr.bf16.mxu0 %v154_v25  ;;  %v121_v25 = vld [vmem:[%s2383_s0 + $0x278] sm:$0xff] }
  0x50   :  { %1649 = vmatmul.mubr.msk.bf16.gmra.mxu1 %vm353_vm0, %v179_v40  ;;  %v178_v28 = vpack.c.bf16 %v124_v26, %v121_v25 }
  0x51   :  { %1652 = vmatprep.mubr.msk.bf16.mxu1 %vm353_vm0, %v182_v41  ;;  %1669 = vmatpush3.bf16.msra.mxu1 %v1733_v15  ;;  %v132_v41 = vld [vmem:[%s2383_s0 + $0x2d0] sm:$0xff] }
  0x52   :  { %1670 = vmatprep.subr.bf16.mxu1 %v1734_v20  ;;  %v183_v43 = vpack.c.bf16 %v135_v42, %v132_v41 }
  0x55   :  { %1671 = vmatpush3.bf16.msra.mxu1 %v1734_v20 }
  0x56   :  { %475 = vmatmul.mubr.bf16.gmra.mxu0 %v153_v34  ;;  %v181_v34 = vpack.c.bf16 %v130_v32, %v127_v31 }
  0x57   :  { %482 = vmatprep.mubr.bf16.mxu0 %v157_v37  ;;  %v133_v37 = vld [vmem:[%s2383_s0 + $0x2d8] sm:$0xff] }
  0x58   :  { %1653 = vmatmul.mubr.msk.bf16.gmra.mxu1 %vm353_vm0, %v185_v50  ;;  %v184_v40 = vpack.c.bf16 %v136_v38, %v133_v37 }
  0x5e   :  { %483 = vmatmul.mubr.bf16.gmra.mxu0 %v156_v46 }
  0x5f   :  { %490 = vmatprep.mubr.bf16.mxu0 %v160_v49 }
  0x66   :  { %491 = vmatmul.mubr.bf16.gmra.mxu0 %v159_v55 }
  0x67   :  { %498 = vmatprep.mubr.bf16.mxu0 %v163_v56 }
  0x6e   :  { %499 = vmatmul.mubr.bf16.gmra.mxu0 %v162_v61 }
  0x6f   :  { %506 = vmatprep.mubr.bf16.mxu0 %v166_v62 }
  0x76   :  { %507 = vmatmul.mubr.bf16.gmra.mxu0 %v165_v5 }
  0x77   :  { %514 = vmatprep.mubr.bf16.mxu0 %v169_v6 }
  0x7e   :  { %515 = vmatmul.mubr.bf16.gmra.mxu0 %v168_v13 }
  0x7f   :  { %522 = vmatprep.mubr.bf16.mxu0 %v172_v14 }
  0x86   :  { %523 = vmatmul.mubr.bf16.gmra.mxu0 %v171_v21 }
  0x87   :  { %530 = vmatprep.mubr.bf16.mxu0 %v175_v22 }
  0x8e   :  { %531 = vmatmul.mubr.bf16.gmra.mxu0 %v174_v27 }
  0x8f   :  { %538 = vmatprep.mubr.bf16.mxu0 %v178_v28 }
  0x96   :  { %539 = vmatmul.mubr.bf16.gmra.mxu0 %v177_v33 }
  0x97   :  { %546 = vmatprep.mubr.bf16.mxu0 %v181_v34 }
  0x9e   :  { %547 = vmatmul.mubr.bf16.gmra.mxu0 %v180_v39 }
  0x9f   :  { %554 = vmatprep.mubr.bf16.mxu0 %v184_v40 }
  0xa6   :  { %555 = vmatmul.mubr.bf16.gmra.mxu0 %v183_v43 }
  0xe0   :  { %v1626_v44 = vpop.f32.mrf.mxu1 }
  0xe2   :  { %v597_v46 = vpop.f32.mrf.mxu1 }
  0xe4   :  { %v1627_v51 = vpop.f32.mrf.mxu1 }
  0xe6   :  { %v600_v56 = vpop.f32.mrf.mxu1 }
  0xe8   :  { %v1630_v63 = vpop.f32.mrf.mxu1 }
  0xea   :  { %v613_v7 = vpop.f32.mrf.mxu1 }
  0xec   :  { %v1631_v14 = vpop.f32.mrf.mxu1 }
  0xee   :  { %v1476_v45 = vpop.f32.mrf.mxu0  ;;  %v616_v22 = vpop.f32.mrf.mxu1 }
  0xf0   :  { %v1477_v47 = vpop.f32.mrf.mxu0  ;;  %v1634_v29 = vpop.f32.mrf.mxu1 }
  0xf1   :  { %v1478_v49 = vadd.f32 %v1477_v47, %v1476_v45 }
  0xf2   :  { %v1479_v50 = vpop.f32.mrf.mxu0  ;;  %v629_v37 = vpop.f32.mrf.mxu1 }
  0xf3   :  { %v437_v52 = vadd.f32 %v1478_v49, %v2198_v48 }
  0xf4   :  { %v1480_v53 = vpop.f32.mrf.mxu0 }
  0xf5   :  { %v1481_v54 = vadd.f32 %v1480_v53, %v1479_v50  ;;  %v598_v57 = vadd.f32 %v597_v46, %v437_v52 }
  0xf6   :  { %v1482_v55 = vpop.f32.mrf.mxu0 }
  0xf7   :  { %v440_v58 = vadd.f32 %v1481_v54, %v2198_v48  ;;  %v724_v0 = vmax.f32 %v598_v57, 0.0 }
  0xf8   :  { %v1483_v59 = vpop.f32.mrf.mxu0 }
  0xf9   :  { %v1484_v60 = vadd.f32 %v1483_v59, %v1482_v55  ;;  %v601_v61 = vadd.f32 %v600_v56, %v440_v58 }
  0xfa   :  { %v1485_v62 = vpop.f32.mrf.mxu0 }
  0xfb   :  { %v445_v1 = vadd.f32 %v1484_v60, %v2198_v48  ;;  %v725_v2 = vmax.f32 %v601_v61, 0.0 }
  0xfc   :  { %v1486_v3 = vpop.f32.mrf.mxu0 }
  0xfd   :  { %v756_v4 = vpack.c.bf16 %v725_v2, %v724_v0  ;;  %v1487_v5 = vadd.f32 %v1486_v3, %v1485_v62  ;;  %v606_v8 = vadd.f32 %v1626_v44, %v445_v1  ;;  %v1635_v44 = vpop.f32.mrf.mxu1 }
  0xfe   :  { %v1488_v6 = vpop.f32.mrf.mxu0 }
  0xff   :  { %v448_v9 = vadd.f32 %v1487_v5, %v2198_v48  ;;  %1672 = vmatprep.mubr.bf16.mxu1 %v756_v4  ;;  %v726_v15 = vmax.f32 %v606_v8, 0.0  ;;  %v632_v53 = vpop.f32.mrf.mxu1 }
 0x100   :  { %v1489_v10 = vpop.f32.mrf.mxu0 }
 0x101   :  { %v609_v11 = vadd.f32 %v1627_v51, %v448_v9  ;;  %v1490_v12 = vadd.f32 %v1489_v10, %v1488_v6  ;;  %v1638_v60 = vpop.f32.mrf.mxu1 }
 0x102   :  { %v1491_v13 = vpop.f32.mrf.mxu0 }
 0x103   :  { %v727_v16 = vmax.f32 %v609_v11, 0.0  ;;  %v453_v17 = vadd.f32 %v1490_v12, %v2198_v48  ;;  %v645_v4 = vpop.f32.mrf.mxu1 }
 0x104   :  { %v1492_v18 = vpop.f32.mrf.mxu0 }
 0x105   :  { %v757_v19 = vpack.c.bf16 %v727_v16, %v726_v15  ;;  %v1493_v20 = vadd.f32 %v1492_v18, %v1491_v13  ;;  %v614_v23 = vadd.f32 %v613_v7, %v453_v17  ;;  %v1639_v11 = vpop.f32.mrf.mxu1 }
 0x106   :  { %v1494_v21 = vpop.f32.mrf.mxu0 }
 0x107   :  { %1673 = vmatmul.mubr.bf16.vlgmr.msra.gmra.mxu1 %v757_v19  ;;  %v456_v24 = vadd.f32 %v1493_v20, %v2198_v48  ;;  %v728_v30 = vmax.f32 %v614_v23, 0.0  ;;  %v648_v19 = vpop.f32.mrf.mxu1 }
 0x108   :  { %v1495_v25 = vpop.f32.mrf.mxu0 }
 0x109   :  { %v1496_v26 = vadd.f32 %v1495_v25, %v1494_v21  ;;  %v617_v27 = vadd.f32 %v616_v22, %v456_v24 }
 0x10a   :  { %v1497_v28 = vpop.f32.mrf.mxu0 }
 0x10b   :  { %v461_v31 = vadd.f32 %v1496_v26, %v2198_v48  ;;  %v729_v32 = vmax.f32 %v617_v27, 0.0  ;;  %v1642_v26 = vpop.f32.mrf.mxu1 }
 0x10c   :  { %v1498_v33 = vpop.f32.mrf.mxu0 }
 0x10d   :  { %v758_v34 = vpack.c.bf16 %v729_v32, %v728_v30  ;;  %v1499_v35 = vadd.f32 %v1498_v33, %v1497_v28  ;;  %v622_v38 = vadd.f32 %v1630_v63, %v461_v31 }
 0x10e   :  { %v1500_v36 = vpop.f32.mrf.mxu0 }
 0x10f   :  { %v464_v39 = vadd.f32 %v1499_v35, %v2198_v48  ;;  %1676 = vmatprep.mubr.bf16.mxu1 %v758_v34  ;;  %v730_v45 = vmax.f32 %v622_v38, 0.0  ;;  %v661_v34 = vpop.f32.mrf.mxu1 }
 0x110   :  { %v1501_v40 = vpop.f32.mrf.mxu0 }
 0x111   :  { %v625_v41 = vadd.f32 %v1631_v14, %v464_v39  ;;  %v1502_v42 = vadd.f32 %v1501_v40, %v1500_v36 }
 0x112   :  { %v1503_v43 = vpop.f32.mrf.mxu0 }
 0x113   :  { %v731_v46 = vmax.f32 %v625_v41, 0.0  ;;  %v469_v47 = vadd.f32 %v1502_v42, %v2198_v48  ;;  %v1643_v41 = vpop.f32.mrf.mxu1 }
 0x114   :  { %v1504_v49 = vpop.f32.mrf.mxu0 }
 0x115   :  { %v1505_v50 = vadd.f32 %v1504_v49, %v1503_v43  ;;  %v759_v51 = vpack.c.bf16 %v731_v46, %v730_v45  ;;  %v630_v54 = vadd.f32 %v629_v37, %v469_v47 }
 0x116   :  { %v1506_v52 = vpop.f32.mrf.mxu0 }
 0x117   :  { %1677 = vmatmul.mubr.bf16.gmra.mxu1 %v759_v51  ;;  %v472_v55 = vadd.f32 %v1505_v50, %v2198_v48  ;;  %v732_v61 = vmax.f32 %v630_v54, 0.0  ;;  %v664_v50 = vpop.f32.mrf.mxu1 }
 0x118   :  { %v1507_v56 = vpop.f32.mrf.mxu0 }
 0x119   :  { %v1508_v57 = vadd.f32 %v1507_v56, %v1506_v52  ;;  %v633_v58 = vadd.f32 %v632_v53, %v472_v55 }
 0x11a   :  { %v1509_v59 = vpop.f32.mrf.mxu0 }
 0x11b   :  { %v477_v62 = vadd.f32 %v1508_v57, %v2198_v48  ;;  %v733_v63 = vmax.f32 %v633_v58, 0.0  ;;  %v1646_v57 = vpop.f32.mrf.mxu1 }
 0x11c   :  { %v1510_v0 = vpop.f32.mrf.mxu0 }
 0x11d   :  { %v760_v1 = vpack.c.bf16 %v733_v63, %v732_v61  ;;  %v1511_v2 = vadd.f32 %v1510_v0, %v1509_v59  ;;  %v638_v5 = vadd.f32 %v1634_v29, %v477_v62 }
 0x11e   :  { %v1512_v3 = vpop.f32.mrf.mxu0 }
 0x11f   :  { %v480_v6 = vadd.f32 %v1511_v2, %v2198_v48  ;;  %1680 = vmatprep.mubr.bf16.mxu1 %v760_v1  ;;  %v734_v12 = vmax.f32 %v638_v5, 0.0  ;;  %v677_v1 = vpop.f32.mrf.mxu1 }
 0x120   :  { %v1513_v7 = vpop.f32.mrf.mxu0 }
 0x121   :  { %v641_v8 = vadd.f32 %v1635_v44, %v480_v6  ;;  %v1514_v9 = vadd.f32 %v1513_v7, %v1512_v3 }
 0x122   :  { %v1515_v10 = vpop.f32.mrf.mxu0 }
 0x123   :  { %v735_v13 = vmax.f32 %v641_v8, 0.0  ;;  %v485_v14 = vadd.f32 %v1514_v9, %v2198_v48  ;;  %v1647_v8 = vpop.f32.mrf.mxu1 }
 0x124   :  { %v1516_v15 = vpop.f32.mrf.mxu0 }
 0x125   :  { %v1517_v16 = vadd.f32 %v1516_v15, %v1515_v10  ;;  %v761_v17 = vpack.c.bf16 %v735_v13, %v734_v12  ;;  %v646_v20 = vadd.f32 %v645_v4, %v485_v14 }
 0x126   :  { %v1518_v18 = vpop.f32.mrf.mxu0 }
 0x127   :  { %1681 = vmatmul.mubr.bf16.gmra.mxu1 %v761_v17  ;;  %v488_v21 = vadd.f32 %v1517_v16, %v2198_v48  ;;  %v736_v27 = vmax.f32 %v646_v20, 0.0  ;;  %v680_v16 = vpop.f32.mrf.mxu1 }
 0x128   :  { %v1519_v22 = vpop.f32.mrf.mxu0 }
 0x129   :  { %v1520_v23 = vadd.f32 %v1519_v22, %v1518_v18  ;;  %v649_v24 = vadd.f32 %v648_v19, %v488_v21 }
 0x12a   :  { %v1521_v25 = vpop.f32.mrf.mxu0 }
 0x12b   :  { %v493_v28 = vadd.f32 %v1520_v23, %v2198_v48  ;;  %v737_v29 = vmax.f32 %v649_v24, 0.0  ;;  %v1650_v23 = vpop.f32.mrf.mxu1 }
 0x12c   :  { %v1522_v30 = vpop.f32.mrf.mxu0 }
 0x12d   :  { %v762_v31 = vpack.c.bf16 %v737_v29, %v736_v27  ;;  %v1523_v32 = vadd.f32 %v1522_v30, %v1521_v25  ;;  %v654_v35 = vadd.f32 %v1638_v60, %v493_v28 }
 0x12e   :  { %v1524_v33 = vpop.f32.mrf.mxu0 }
 0x12f   :  { %v496_v36 = vadd.f32 %v1523_v32, %v2198_v48  ;;  %1684 = vmatprep.mubr.bf16.mxu1 %v762_v31  ;;  %v738_v42 = vmax.f32 %v654_v35, 0.0  ;;  %v693_v31 = vpop.f32.mrf.mxu1 }
 0x130   :  { %v1525_v37 = vpop.f32.mrf.mxu0 }
 0x131   :  { %v657_v38 = vadd.f32 %v1639_v11, %v496_v36  ;;  %v1526_v39 = vadd.f32 %v1525_v37, %v1524_v33 }
 0x132   :  { %v1527_v40 = vpop.f32.mrf.mxu0 }
 0x133   :  { %v739_v43 = vmax.f32 %v657_v38, 0.0  ;;  %v501_v44 = vadd.f32 %v1526_v39, %v2198_v48  ;;  %v1651_v38 = vpop.f32.mrf.mxu1 }
 0x134   :  { %v1528_v45 = vpop.f32.mrf.mxu0 }
 0x135   :  { %v1529_v46 = vadd.f32 %v1528_v45, %v1527_v40  ;;  %v763_v47 = vpack.c.bf16 %v739_v43, %v738_v42  ;;  %v662_v51 = vadd.f32 %v661_v34, %v501_v44 }
 0x136   :  { %v1530_v49 = vpop.f32.mrf.mxu0 }
 0x137   :  { %1685 = vmatmul.mubr.bf16.gmra.mxu1 %v763_v47  ;;  %v504_v52 = vadd.f32 %v1529_v46, %v2198_v48  ;;  %v740_v58 = vmax.f32 %v662_v51, 0.0  ;;  %v696_v46 = vpop.f32.mrf.mxu1 }
 0x138   :  { %v1531_v53 = vpop.f32.mrf.mxu0 }
 0x139   :  { %v1532_v54 = vadd.f32 %v1531_v53, %v1530_v49  ;;  %v665_v55 = vadd.f32 %v664_v50, %v504_v52 }
 0x13a   :  { %v1533_v56 = vpop.f32.mrf.mxu0 }
 0x13b   :  { %v509_v59 = vadd.f32 %v1532_v54, %v2198_v48  ;;  %v741_v60 = vmax.f32 %v665_v55, 0.0  ;;  %v1654_v54 = vpop.f32.mrf.mxu1 }
 0x13c   :  { %v1534_v61 = vpop.f32.mrf.mxu0 }
 0x13d   :  { %v764_v62 = vpack.c.bf16 %v741_v60, %v740_v58  ;;  %v1535_v63 = vadd.f32 %v1534_v61, %v1533_v56  ;;  %v670_v2 = vadd.f32 %v1642_v26, %v509_v59 }
 0x13e   :  { %v1536_v0 = vpop.f32.mrf.mxu0 }
 0x13f   :  { %v512_v3 = vadd.f32 %v1535_v63, %v2198_v48  ;;  %1688 = vmatprep.mubr.bf16.mxu1 %v764_v62  ;;  %v742_v9 = vmax.f32 %v670_v2, 0.0  ;;  %v709_v62 = vpop.f32.mrf.mxu1 }
 0x140   :  { %v1537_v4 = vpop.f32.mrf.mxu0 }
 0x141   :  { %v673_v5 = vadd.f32 %v1643_v41, %v512_v3  ;;  %v1538_v6 = vadd.f32 %v1537_v4, %v1536_v0 }
 0x142   :  { %v1539_v7 = vpop.f32.mrf.mxu0 }
 0x143   :  { %v743_v10 = vmax.f32 %v673_v5, 0.0  ;;  %v517_v11 = vadd.f32 %v1538_v6, %v2198_v48  ;;  %v1655_v5 = vpop.f32.mrf.mxu1 }
 0x144   :  { %v1540_v12 = vpop.f32.mrf.mxu0 }
 0x145   :  { %v1541_v13 = vadd.f32 %v1540_v12, %v1539_v7  ;;  %v765_v14 = vpack.c.bf16 %v743_v10, %v742_v9  ;;  %v678_v17 = vadd.f32 %v677_v1, %v517_v11 }
 0x146   :  { %v1542_v15 = vpop.f32.mrf.mxu0 }
 0x147   :  { %1689 = vmatmul.mubr.bf16.gmra.mxu1 %v765_v14  ;;  %v520_v18 = vadd.f32 %v1541_v13, %v2198_v48  ;;  %v744_v24 = vmax.f32 %v678_v17, 0.0  ;;  %v712_v13 = vpop.f32.mrf.mxu1 }
 0x148   :  { %v1543_v19 = vpop.f32.mrf.mxu0 }
 0x149   :  { %v1544_v20 = vadd.f32 %v1543_v19, %v1542_v15  ;;  %v681_v21 = vadd.f32 %v680_v16, %v520_v18 }
 0x14a   :  { %v1545_v22 = vpop.f32.mrf.mxu0 }
 0x14b   :  { %v525_v25 = vadd.f32 %v1544_v20, %v2198_v48  ;;  %v745_v26 = vmax.f32 %v681_v21, 0.0 }
 0x14c   :  { %v1546_v27 = vpop.f32.mrf.mxu0 }
 0x14d   :  { %v766_v28 = vpack.c.bf16 %v745_v26, %v744_v24  ;;  %v1547_v29 = vadd.f32 %v1546_v27, %v1545_v22  ;;  %v686_v32 = vadd.f32 %v1646_v57, %v525_v25 }
 0x14e   :  { %v1548_v30 = vpop.f32.mrf.mxu0 }
 0x14f   :  { %v528_v33 = vadd.f32 %v1547_v29, %v2198_v48  ;;  %1692 = vmatprep.mubr.bf16.mxu1 %v766_v28  ;;  %v746_v39 = vmax.f32 %v686_v32, 0.0  ;;  %v2235_v32 = vld [vmem:[%s2387_s4] ss:$0 sm:$0xff] }
 0x150   :  { %v1549_v34 = vpop.f32.mrf.mxu0 }
 0x151   :  { %v689_v35 = vadd.f32 %v1647_v8, %v528_v33  ;;  %v1550_v36 = vadd.f32 %v1549_v34, %v1548_v30 }
 0x152   :  { %v1551_v37 = vpop.f32.mrf.mxu0 }
 0x153   :  { %v747_v40 = vmax.f32 %v689_v35, 0.0  ;;  %v533_v41 = vadd.f32 %v1550_v36, %v2198_v48  ;;  %v2241_v36 = vld [vmem:[%s2388_s5] ss:$0 sm:$0xff] }
 0x154   :  { %v1552_v42 = vpop.f32.mrf.mxu0 }
 0x155   :  { %v1553_v43 = vadd.f32 %v1552_v42, %v1551_v37  ;;  %v767_v44 = vpack.c.bf16 %v747_v40, %v746_v39  ;;  %v694_v47 = vadd.f32 %v693_v31, %v533_v41 }
 0x156   :  { %v1554_v45 = vpop.f32.mrf.mxu0 }
 0x157   :  { %1693 = vmatmul.mubr.bf16.gmra.mxu1 %v767_v44  ;;  %v536_v49 = vadd.f32 %v1553_v43, %v2198_v48  ;;  %v748_v55 = vmax.f32 %v694_v47, 0.0 }
 0x158   :  { %v1555_v50 = vpop.f32.mrf.mxu0 }
 0x159   :  { %v1556_v51 = vadd.f32 %v1555_v50, %v1554_v45  ;;  %v697_v52 = vadd.f32 %v696_v46, %v536_v49 }
 0x15a   :  { %v1557_v53 = vpop.f32.mrf.mxu0 }
 0x15b   :  { %v541_v56 = vadd.f32 %v1556_v51, %v2198_v48  ;;  %v749_v57 = vmax.f32 %v697_v52, 0.0 }
 0x15c   :  { %v1558_v58 = vpop.f32.mrf.mxu0 }
 0x15d   :  { %v768_v59 = vpack.c.bf16 %v749_v57, %v748_v55  ;;  %v1559_v60 = vadd.f32 %v1558_v58, %v1557_v53  ;;  %v702_v63 = vadd.f32 %v1650_v23, %v541_v56 }
 0x15e   :  { %v1560_v61 = vpop.f32.mrf.mxu0 }
 0x15f   :  { %v544_v0 = vadd.f32 %v1559_v60, %v2198_v48  ;;  %1696 = vmatprep.mubr.bf16.mxu1 %v768_v59  ;;  %v750_v6 = vmax.f32 %v702_v63, 0.0 }
 0x160   :  { %v1561_v1 = vpop.f32.mrf.mxu0 }
 0x161   :  { %v705_v2 = vadd.f32 %v1651_v38, %v544_v0  ;;  %v1562_v3 = vadd.f32 %v1561_v1, %v1560_v61 }
 0x162   :  { %v1563_v4 = vpop.f32.mrf.mxu0 }
 0x163   :  { %v751_v7 = vmax.f32 %v705_v2, 0.0  ;;  %v549_v8 = vadd.f32 %v1562_v3, %v2198_v48 }
 0x164   :  { %v1564_v9 = vpop.f32.mrf.mxu0 }
 0x165   :  { %v1565_v10 = vadd.f32 %v1564_v9, %v1563_v4  ;;  %v769_v11 = vpack.c.bf16 %v751_v7, %v750_v6  ;;  %v710_v14 = vadd.f32 %v709_v62, %v549_v8 }
 0x166   :  { %v1566_v12 = vpop.f32.mrf.mxu0 }
 0x167   :  { %1697 = vmatmul.mubr.bf16.gmra.mxu1 %v769_v11  ;;  %v552_v15 = vadd.f32 %v1565_v10, %v2198_v48  ;;  %v752_v20 = vmax.f32 %v710_v14, 0.0 }
 0x168   :  { %v1567_v16 = vpop.f32.mrf.mxu0 }
 0x169   :  { %v1568_v17 = vadd.f32 %v1567_v16, %v1566_v12  ;;  %v713_v18 = vadd.f32 %v712_v13, %v552_v15 }
 0x16a   :  { %v1569_v19 = vpop.f32.mrf.mxu0 }
 0x16b   :  { %v557_v21 = vadd.f32 %v1568_v17, %v2198_v48  ;;  %v753_v22 = vmax.f32 %v713_v18, 0.0 }
 0x16c   :  { %v1570_v23 = vpop.f32.mrf.mxu0 }
 0x16d   :  { %v770_v24 = vpack.c.bf16 %v753_v22, %v752_v20  ;;  %v1571_v25 = vadd.f32 %v1570_v23, %v1569_v19  ;;  %v718_v26 = vadd.f32 %v1654_v54, %v557_v21 }
 0x16f   :  { %v560_v27 = vadd.f32 %v1571_v25, %v2198_v48  ;;  %1700 = vmatprep.mubr.bf16.mxu1 %v770_v24  ;;  %v754_v29 = vmax.f32 %v718_v26, 0.0 }
 0x171   :  { %v721_v28 = vadd.f32 %v1655_v5, %v560_v27 }
 0x173   :  { %v755_v30 = vmax.f32 %v721_v28, 0.0 }
 0x175   :  { %v771_v31 = vpack.c.bf16 %v755_v30, %v754_v29 }
 0x177   :  { %1701 = vmatmul.mubr.bf16.gmra.mxu1 %v771_v31 }
 0x1c7   :  { %v1674_v33 = vpop.f32.mrf.mxu1 }
 0x1c8   :  { %v886_v34 = vadd.f32 %v1674_v33, %v2235_v32 }
 0x1c9   :  { %v877_v35 = vpop.f32.mrf.mxu1 }
 0x1ca   :  { %v1006_v48 = vmax.f32 %v886_v34, 0.0  ;;  %v878_v37 = vadd.f32 %v2235_v32, %v877_v35 }
 0x1cb   :  { %v1675_v38 = vpop.f32.mrf.mxu1 }
 0x1cc   :  { %v1004_v39 = vmax.f32 %v878_v37, 0.0  ;;  %v889_v40 = vadd.f32 %v1675_v38, %v2235_v32  ;;  %v1045_v41 = vmul.f32 %v2241_v36, %v1006_v48 }
 0x1cd   :  { %v880_v42 = vpop.f32.mrf.mxu1 }
 0x1ce   :  { %v1007_v43 = vmax.f32 %v889_v40, 0.0  ;;  %v881_v44 = vadd.f32 %v2235_v32, %v880_v42  ;;  %v1082_v45 = vsel %vm1075_vm1, %v1045_v41, 0.0  ;;  %v1043_v46 = vmul.f32 %v2241_v36, %v1004_v39 }
 0x1cf   :  { %1083 = vadd.xlane.f32.xlu1 %v1082_v45 }
 0x1d0   :  { %v1005_v47 = vmax.f32 %v881_v44, 0.0  ;;  %v1076_v49 = vsel %vm1075_vm1, %v1043_v46, 0.0  ;;  %v1046_v50 = vmul.f32 %v2241_v36, %v1007_v43 }
 0x1d1   :  { %1077 = vadd.xlane.f32.xlu0 %v1076_v49 }
 0x1d2   :  { %v1085_v51 = vsel %vm1075_vm1, %v1046_v50, 0.0  ;;  %v1044_v52 = vmul.f32 %v2241_v36, %v1005_v47 }
 0x1d3   :  { %1086 = vadd.xlane.f32.xlu1 %v1085_v51 }
 0x1d4   :  { %v1079_v53 = vsel %vm1075_vm1, %v1044_v52, 0.0 }
 0x1d5   :  { %1080 = vadd.xlane.f32.xlu0 %v1079_v53 }
 0x1d7   :  { %v1678_v54 = vpop.f32.mrf.mxu1 }
 0x1d8   :  { %v902_v55 = vadd.f32 %v1678_v54, %v2235_v32 }
 0x1d9   :  { %v893_v56 = vpop.f32.mrf.mxu1 }
 0x1da   :  { %v1010_v57 = vmax.f32 %v902_v55, 0.0  ;;  %v894_v58 = vadd.f32 %v2235_v32, %v893_v56 }
 0x1db   :  { %v1679_v59 = vpop.f32.mrf.mxu1 }
 0x1dc   :  { %v1008_v60 = vmax.f32 %v894_v58, 0.0  ;;  %v905_v61 = vadd.f32 %v1679_v59, %v2235_v32  ;;  %v1049_v62 = vmul.f32 %v2241_v36, %v1010_v57 }
 0x1dd   :  { %v896_v63 = vpop.f32.mrf.mxu1 }
 0x1de   :  { %v1011_v0 = vmax.f32 %v905_v61, 0.0  ;;  %v897_v1 = vadd.f32 %v2235_v32, %v896_v63  ;;  %v1094_v2 = vsel %vm1075_vm1, %v1049_v62, 0.0  ;;  %v1047_v3 = vmul.f32 %v2241_v36, %v1008_v60 }
 0x1df   :  { %1095 = vadd.xlane.f32.xlu0 %v1094_v2 }
 0x1e0   :  { %v1009_v4 = vmax.f32 %v897_v1, 0.0  ;;  %v1050_v5 = vmul.f32 %v2241_v36, %v1011_v0  ;;  %v1088_v7 = vsel %vm1075_vm1, %v1047_v3, 0.0 }
 0x1e2   :  { %v1097_v6 = vsel %vm1075_vm1, %v1050_v5, 0.0  ;;  %v1048_v8 = vmul.f32 %v2241_v36, %v1009_v4 }
 0x1e3   :  { %1098 = vadd.xlane.f32.xlu1 %v1097_v6  ;;  %1089 = vadd.xlane.f32.xlu0 %v1088_v7 }
 0x1e4   :  { %v1091_v9 = vsel %vm1075_vm1, %v1048_v8, 0.0 }
 0x1e7   :  { %v1682_v10 = vpop.f32.mrf.mxu1  ;;  %1092 = vadd.xlane.f32.xlu1 %v1091_v9 }
 0x1e8   :  { %v918_v11 = vadd.f32 %v1682_v10, %v2235_v32 }
 0x1e9   :  { %v909_v12 = vpop.f32.mrf.mxu1 }
 0x1ea   :  { %v1014_v13 = vmax.f32 %v918_v11, 0.0  ;;  %v910_v14 = vadd.f32 %v2235_v32, %v909_v12 }
 0x1eb   :  { %v1683_v15 = vpop.f32.mrf.mxu1 }
 0x1ec   :  { %v1012_v16 = vmax.f32 %v910_v14, 0.0  ;;  %v921_v17 = vadd.f32 %v1683_v15, %v2235_v32  ;;  %v1053_v18 = vmul.f32 %v2241_v36, %v1014_v13 }
 0x1ed   :  { %v912_v19 = vpop.f32.mrf.mxu1 }
 0x1ee   :  { %v1015_v20 = vmax.f32 %v921_v17, 0.0  ;;  %v913_v21 = vadd.f32 %v2235_v32, %v912_v19  ;;  %v1106_v22 = vsel %vm1075_vm1, %v1053_v18, 0.0  ;;  %v1051_v23 = vmul.f32 %v2241_v36, %v1012_v16 }
 0x1ef   :  { %1107 = vadd.xlane.f32.xlu0 %v1106_v22 }
 0x1f0   :  { %v1013_v24 = vmax.f32 %v913_v21, 0.0  ;;  %v1054_v25 = vmul.f32 %v2241_v36, %v1015_v20  ;;  %v1100_v27 = vsel %vm1075_vm1, %v1051_v23, 0.0 }
 0x1f2   :  { %v1109_v26 = vsel %vm1075_vm1, %v1054_v25, 0.0  ;;  %v1052_v28 = vmul.f32 %v2241_v36, %v1013_v24 }
 0x1f3   :  { %1110 = vadd.xlane.f32.xlu1 %v1109_v26  ;;  %1101 = vadd.xlane.f32.xlu0 %v1100_v27 }
 0x1f4   :  { %v1103_v29 = vsel %vm1075_vm1, %v1052_v28, 0.0 }
 0x1f7   :  { %v1686_v30 = vpop.f32.mrf.mxu1  ;;  %1104 = vadd.xlane.f32.xlu1 %v1103_v29 }
 0x1f8   :  { %v934_v31 = vadd.f32 %v1686_v30, %v2235_v32 }
 0x1f9   :  { %v925_v33 = vpop.f32.mrf.mxu1 }
 0x1fa   :  { %v1018_v34 = vmax.f32 %v934_v31, 0.0  ;;  %v926_v35 = vadd.f32 %v2235_v32, %v925_v33 }
 0x1fb   :  { %v1687_v48 = vpop.f32.mrf.mxu1 }
 0x1fc   :  { %v1016_v37 = vmax.f32 %v926_v35, 0.0  ;;  %v937_v38 = vadd.f32 %v1687_v48, %v2235_v32  ;;  %v1057_v39 = vmul.f32 %v2241_v36, %v1018_v34 }
 0x1fd   :  { %v928_v40 = vpop.f32.mrf.mxu1 }
 0x1fe   :  { %v1019_v41 = vmax.f32 %v937_v38, 0.0  ;;  %v929_v42 = vadd.f32 %v2235_v32, %v928_v40  ;;  %v1118_v43 = vsel %vm1075_vm1, %v1057_v39, 0.0  ;;  %v1055_v44 = vmul.f32 %v2241_v36, %v1016_v37 }
 0x1ff   :  { %1119 = vadd.xlane.f32.xlu0 %v1118_v43 }
 0x200   :  { %v1017_v45 = vmax.f32 %v929_v42, 0.0  ;;  %v1058_v46 = vmul.f32 %v2241_v36, %v1019_v41  ;;  %v1112_v49 = vsel %vm1075_vm1, %v1055_v44, 0.0 }
 0x202   :  { %v1121_v47 = vsel %vm1075_vm1, %v1058_v46, 0.0  ;;  %v1056_v50 = vmul.f32 %v2241_v36, %v1017_v45 }
 0x203   :  { %1122 = vadd.xlane.f32.xlu1 %v1121_v47  ;;  %1113 = vadd.xlane.f32.xlu0 %v1112_v49 }
 0x204   :  { %v1115_v51 = vsel %vm1075_vm1, %v1056_v50, 0.0 }
 0x207   :  { %v1690_v52 = vpop.f32.mrf.mxu1  ;;  %1116 = vadd.xlane.f32.xlu1 %v1115_v51 }
 0x208   :  { %v950_v53 = vadd.f32 %v1690_v52, %v2235_v32 }
 0x209   :  { %v941_v54 = vpop.f32.mrf.mxu1 }
 0x20a   :  { %v1022_v55 = vmax.f32 %v950_v53, 0.0  ;;  %v942_v56 = vadd.f32 %v2235_v32, %v941_v54 }
 0x20b   :  { %v1691_v57 = vpop.f32.mrf.mxu1 }
 0x20c   :  { %v1020_v58 = vmax.f32 %v942_v56, 0.0  ;;  %v953_v59 = vadd.f32 %v1691_v57, %v2235_v32  ;;  %v1061_v60 = vmul.f32 %v2241_v36, %v1022_v55 }
 0x20d   :  { %v944_v61 = vpop.f32.mrf.mxu1 }
 0x20e   :  { %v1023_v62 = vmax.f32 %v953_v59, 0.0  ;;  %v945_v63 = vadd.f32 %v2235_v32, %v944_v61  ;;  %v1130_v0 = vsel %vm1075_vm1, %v1061_v60, 0.0  ;;  %v1059_v1 = vmul.f32 %v2241_v36, %v1020_v58 }
 0x20f   :  { %1131 = vadd.xlane.f32.xlu0 %v1130_v0 }
 0x210   :  { %v1021_v2 = vmax.f32 %v945_v63, 0.0  ;;  %v1062_v3 = vmul.f32 %v2241_v36, %v1023_v62  ;;  %v1124_v5 = vsel %vm1075_vm1, %v1059_v1, 0.0 }
 0x212   :  { %v1133_v4 = vsel %vm1075_vm1, %v1062_v3, 0.0  ;;  %v1060_v6 = vmul.f32 %v2241_v36, %v1021_v2 }
 0x213   :  { %1134 = vadd.xlane.f32.xlu1 %v1133_v4  ;;  %1125 = vadd.xlane.f32.xlu0 %v1124_v5  ;;  %v2341_v5 = vstv %s2389_s6 }
 0x214   :  { %v1127_v7 = vsel %vm1075_vm1, %v1060_v6, 0.0 }
 0x217   :  { %v1694_v8 = vpop.f32.mrf.mxu1  ;;  %1128 = vadd.xlane.f32.xlu1 %v1127_v7 }
 0x218   :  { %v966_v9 = vadd.f32 %v1694_v8, %v2235_v32 }
 0x219   :  { %v957_v10 = vpop.f32.mrf.mxu1 }
 0x21a   :  { %v1026_v11 = vmax.f32 %v966_v9, 0.0  ;;  %v958_v12 = vadd.f32 %v2235_v32, %v957_v10 }
 0x21b   :  { %v1695_v13 = vpop.f32.mrf.mxu1 }
 0x21c   :  { %v1024_v14 = vmax.f32 %v958_v12, 0.0  ;;  %v969_v15 = vadd.f32 %v1695_v13, %v2235_v32  ;;  %v1065_v16 = vmul.f32 %v2241_v36, %v1026_v11 }
 0x21d   :  { %v960_v17 = vpop.f32.mrf.mxu1 }
 0x21e   :  { %v1027_v18 = vmax.f32 %v969_v15, 0.0  ;;  %v961_v19 = vadd.f32 %v2235_v32, %v960_v17  ;;  %v1142_v20 = vsel %vm1075_vm1, %v1065_v16, 0.0  ;;  %v1063_v21 = vmul.f32 %v2241_v36, %v1024_v14 }
 0x21f   :  { %1143 = vadd.xlane.f32.xlu0 %v1142_v20 }
 0x220   :  { %v1025_v22 = vmax.f32 %v961_v19, 0.0  ;;  %v1066_v23 = vmul.f32 %v2241_v36, %v1027_v18  ;;  %v1136_v25 = vsel %vm1075_vm1, %v1063_v21, 0.0 }
 0x222   :  { %v1145_v24 = vsel %vm1075_vm1, %v1066_v23, 0.0  ;;  %v1064_v26 = vmul.f32 %v2241_v36, %v1025_v22 }
 0x223   :  { %1146 = vadd.xlane.f32.xlu1 %v1145_v24  ;;  %1137 = vadd.xlane.f32.xlu0 %v1136_v25 }
 0x224   :  { %v1139_v27 = vsel %vm1075_vm1, %v1064_v26, 0.0 }
 0x227   :  { %v1698_v28 = vpop.f32.mrf.mxu1  ;;  %1140 = vadd.xlane.f32.xlu1 %v1139_v27 }
 0x228   :  { %v982_v29 = vadd.f32 %v1698_v28, %v2235_v32 }
 0x229   :  { %v973_v30 = vpop.f32.mrf.mxu1 }
 0x22a   :  { %v1030_v31 = vmax.f32 %v982_v29, 0.0  ;;  %v974_v33 = vadd.f32 %v2235_v32, %v973_v30 }
 0x22b   :  { %v1699_v34 = vpop.f32.mrf.mxu1 }
 0x22c   :  { %v1028_v35 = vmax.f32 %v974_v33, 0.0  ;;  %v985_v48 = vadd.f32 %v1699_v34, %v2235_v32  ;;  %v1069_v37 = vmul.f32 %v2241_v36, %v1030_v31 }
 0x22d   :  { %v976_v38 = vpop.f32.mrf.mxu1 }
 0x22e   :  { %v1031_v39 = vmax.f32 %v985_v48, 0.0  ;;  %v977_v40 = vadd.f32 %v2235_v32, %v976_v38  ;;  %v1154_v41 = vsel %vm1075_vm1, %v1069_v37, 0.0  ;;  %v1067_v42 = vmul.f32 %v2241_v36, %v1028_v35 }
 0x22f   :  { %1155 = vadd.xlane.f32.xlu0 %v1154_v41 }
 0x230   :  { %v1029_v43 = vmax.f32 %v977_v40, 0.0  ;;  %v1070_v44 = vmul.f32 %v2241_v36, %v1031_v39  ;;  %v1148_v46 = vsel %vm1075_vm1, %v1067_v42, 0.0 }
 0x232   :  { %v1157_v45 = vsel %vm1075_vm1, %v1070_v44, 0.0  ;;  %v1068_v47 = vmul.f32 %v2241_v36, %v1029_v43 }
 0x233   :  { %1158 = vadd.xlane.f32.xlu1 %v1157_v45  ;;  %1149 = vadd.xlane.f32.xlu0 %v1148_v46 }
 0x234   :  { %v1151_v49 = vsel %vm1075_vm1, %v1068_v47, 0.0 }
 0x237   :  { %v1702_v50 = vpop.f32.mrf.mxu1  ;;  %1152 = vadd.xlane.f32.xlu1 %v1151_v49 }
 0x238   :  { %v998_v51 = vadd.f32 %v1702_v50, %v2235_v32 }
 0x239   :  { %v989_v52 = vpop.f32.mrf.mxu1 }
 0x23a   :  { %v990_v53 = vadd.f32 %v2235_v32, %v989_v52  ;;  %v1034_v55 = vmax.f32 %v998_v51, 0.0 }
 0x23b   :  { %v1703_v54 = vpop.f32.mrf.mxu1 }
 0x23c   :  { %v1032_v56 = vmax.f32 %v990_v53, 0.0  ;;  %v1001_v57 = vadd.f32 %v1703_v54, %v2235_v32  ;;  %v1073_v0 = vmul.f32 %v2241_v36, %v1034_v55 }
 0x23d   :  { %v992_v58 = vpop.f32.mrf.mxu1 }
 0x23e   :  { %v993_v59 = vadd.f32 %v2235_v32, %v992_v58  ;;  %v1071_v60 = vmul.f32 %v2241_v36, %v1032_v56  ;;  %v1035_v61 = vmax.f32 %v1001_v57, 0.0  ;;  %v1166_v3 = vsel %vm1075_vm1, %v1073_v0, 0.0 }
 0x240   :  { %v1033_v62 = vmax.f32 %v993_v59, 0.0  ;;  %v1160_v63 = vsel %vm1075_vm1, %v1071_v60, 0.0  ;;  %v1074_v4 = vmul.f32 %v2241_v36, %v1035_v61 }
 0x241   :  { %1161 = vadd.xlane.f32.xlu0 %v1160_v63 }
 0x242   :  { %v1072_v1 = vmul.f32 %v2241_v36, %v1033_v62  ;;  %v1169_v32 = vsel %vm1075_vm1, %v1074_v4, 0.0 }
 0x244   :  { %v1163_v2 = vsel %vm1075_vm1, %v1072_v1, 0.0 }
 0x245   :  { %1164 = vadd.xlane.f32.xlu1 %v1163_v2  ;;  %1167 = vadd.xlane.f32.xlu0 %v1166_v3 }
 0x249   :  { %1170 = vadd.xlane.f32.xlu1 %v1169_v32 }
 0x258   :  { %v1084_v6 = vpop.xlane.xlu1 %1083 }
 0x259   :  { %v1176_v7 = vadd.f32 %v2341_v5, %v1084_v6 }
 0x25a   :  { %v1078_v8 = vpop.xlane.xlu0 %1077 }
 0x25b   :  { %v1208_v9 = vmul.f32 0.5, %v1176_v7  ;;  %v1174_v10 = vadd.f32 %v2341_v5, %v1078_v8 }
 0x25c   :  { %v1087_v11 = vpop.xlane.xlu1 %1086 }
 0x25d   :  { %1735 = vtanh.f32 %v1208_v9  ;;  %v1206_v36 = vmul.f32 0.5, %v1174_v10  ;;  %v1177_v12 = vadd.f32 %v2341_v5, %v1087_v11 }
 0x25e   :  { %v1081_v13 = vpop.xlane.xlu0 %1080 }
 0x25f   :  { %1737 = vtanh.f32 %v1206_v36  ;;  %v1209_v14 = vmul.f32 0.5, %v1177_v12  ;;  %v1175_v15 = vadd.f32 %v2341_v5, %v1081_v13 }
 0x261   :  { %1739 = vtanh.f32 %v1209_v14  ;;  %v1207_v16 = vmul.f32 0.5, %v1175_v15 }
 0x263   :  { %1741 = vtanh.f32 %v1207_v16 }
 0x268   :  { %v1096_v17 = vpop.xlane.xlu0 %1095 }
 0x269   :  { %v1180_v18 = vadd.f32 %v2341_v5, %v1096_v17 }
 0x26a   :  { %v1736_v19 = vpop.eup %1735 }
 0x26b   :  { %v1212_v20 = vmul.f32 0.5, %v1180_v18 }
 0x26c   :  { %v1738_v21 = vpop.eup %1737  ;;  %v1099_v22 = vpop.xlane.xlu1 %1098 }
 0x26d   :  { %v1090_v23 = vpop.xlane.xlu0 %1089  ;;  %v1270_v24 = vadd.f32 1.0, %v1738_v21  ;;  %1743 = vtanh.f32 %v1212_v20  ;;  %v1181_v25 = vadd.f32 %v2341_v5, %v1099_v22 }
 0x26e   :  { %v1740_v26 = vpop.eup %1739  ;;  %v1178_v27 = vadd.f32 %v2341_v5, %v1090_v23 }
 0x26f   :  { %v1302_v28 = vmul.f32 0.5, %v1270_v24  ;;  %v1213_v29 = vmul.f32 0.5, %v1181_v25 }
 0x270   :  { %v1742_v30 = vpop.eup %1741  ;;  %v1210_v31 = vmul.f32 0.5, %v1178_v27  ;;  %v1093_v33 = vpop.xlane.xlu1 %1092 }
 0x271   :  { %1335 = vst.msk [vmem:[#allocation5] sm:$0xff] %vm1334_vm2, %v1302_v28  ;;  %v1271_v34 = vadd.f32 1.0, %v1742_v30  ;;  %1745 = vtanh.f32 %v1213_v29  ;;  %v1179_v35 = vadd.f32 %v2341_v5, %v1093_v33 }
 0x272   :  { %1747 = vtanh.f32 %v1210_v31 }
 0x273   :  { %v1303_v48 = vmul.f32 0.5, %v1271_v34  ;;  %v1211_v37 = vmul.f32 0.5, %v1179_v35 }
 0x275   :  { %1336 = vst.msk [vmem:[#allocation5 + $0x8] sm:$0xff] %vm1334_vm2, %v1303_v48  ;;  %1749 = vtanh.f32 %v1211_v37 }
 0x278   :  { %v1399_v38 = vld [vmem:[#allocation5] sm:$0xff]  ;;  %v1108_v39 = vpop.xlane.xlu0 %1107 }
 0x279   :  { %1400 = vst [vmem:[%s2390_s7] sm:$0xff] %v1399_v38  ;;  %v1184_v40 = vadd.f32 %v2341_v5, %v1108_v39 }
 0x27a   :  { %v1744_v41 = vpop.eup %1743 }
 0x27b   :  { %v1216_v42 = vmul.f32 0.5, %v1184_v40 }
 0x27c   :  { %v1401_v43 = vld [vmem:[#allocation5 + $0x8] sm:$0xff]  ;;  %v1111_v44 = vpop.xlane.xlu1 %1110  ;;  %v1102_v45 = vpop.xlane.xlu0 %1101 }
 0x27d   :  { %1402 = vst [vmem:[%s2390_s7 + $0x8] sm:$0xff] %v1401_v43  ;;  %1751 = vtanh.f32 %v1216_v42  ;;  %v1185_v46 = vadd.f32 %v2341_v5, %v1111_v44  ;;  %v1182_v47 = vadd.f32 %v2341_v5, %v1102_v45 }
 0x27e   :  { %v1746_v49 = vpop.eup %1745 }
 0x27f   :  { %v1748_v50 = vpop.eup %1747  ;;  %v1217_v51 = vmul.f32 0.5, %v1185_v46  ;;  %v1214_v52 = vmul.f32 0.5, %v1182_v47 }
 0x280   :  { %v1105_v53 = vpop.xlane.xlu1 %1104 }
 0x281   :  { %1753 = vtanh.f32 %v1217_v51  ;;  %v1183_v54 = vadd.f32 %v2341_v5, %v1105_v53 }
 0x282   :  { %v1750_v55 = vpop.eup %1749  ;;  %1755 = vtanh.f32 %v1214_v52 }
 0x283   :  { %v1215_v56 = vmul.f32 0.5, %v1183_v54 }
 0x285   :  { %1757 = vtanh.f32 %v1215_v56 }
 0x288   :  { %v1120_v57 = vpop.xlane.xlu0 %1119 }
 0x289   :  { %v1188_v58 = vadd.f32 %v2341_v5, %v1120_v57 }
 0x28a   :  { %v1752_v59 = vpop.eup %1751 }
 0x28b   :  { %v1220_v60 = vmul.f32 0.5, %v1188_v58 }
 0x28c   :  { %v1123_v61 = vpop.xlane.xlu1 %1122  ;;  %v1114_v62 = vpop.xlane.xlu0 %1113 }
 0x28d   :  { %1759 = vtanh.f32 %v1220_v60  ;;  %v1189_v63 = vadd.f32 %v2341_v5, %v1123_v61  ;;  %v1186_v0 = vadd.f32 %v2341_v5, %v1114_v62 }
 0x28e   :  { %v1754_v1 = vpop.eup %1753 }
 0x28f   :  { %v1756_v2 = vpop.eup %1755  ;;  %v1221_v3 = vmul.f32 0.5, %v1189_v63  ;;  %v1218_v4 = vmul.f32 0.5, %v1186_v0 }
 0x290   :  { %v1117_v32 = vpop.xlane.xlu1 %1116 }
 0x291   :  { %1761 = vtanh.f32 %v1221_v3  ;;  %v1187_v6 = vadd.f32 %v2341_v5, %v1117_v32 }
 0x292   :  { %v1758_v7 = vpop.eup %1757  ;;  %1763 = vtanh.f32 %v1218_v4 }
 0x293   :  { %v1219_v8 = vmul.f32 0.5, %v1187_v6 }
 0x295   :  { %1765 = vtanh.f32 %v1219_v8 }
 0x298   :  { %v1132_v9 = vpop.xlane.xlu0 %1131 }
 0x299   :  { %v1192_v10 = vadd.f32 %v2341_v5, %v1132_v9 }
 0x29a   :  { %v1760_v11 = vpop.eup %1759 }
 0x29b   :  { %v1224_v36 = vmul.f32 0.5, %v1192_v10 }
 0x29c   :  { %v1135_v12 = vpop.xlane.xlu1 %1134  ;;  %v1126_v13 = vpop.xlane.xlu0 %1125 }
 0x29d   :  { %1767 = vtanh.f32 %v1224_v36  ;;  %v1193_v14 = vadd.f32 %v2341_v5, %v1135_v12  ;;  %v1190_v15 = vadd.f32 %v2341_v5, %v1126_v13 }
 0x29e   :  { %v1762_v16 = vpop.eup %1761 }
 0x29f   :  { %v1764_v17 = vpop.eup %1763  ;;  %v1225_v18 = vmul.f32 0.5, %v1193_v14  ;;  %v1222_v19 = vmul.f32 0.5, %v1190_v15 }
 0x2a0   :  { %v1129_v20 = vpop.xlane.xlu1 %1128 }
 0x2a1   :  { %1769 = vtanh.f32 %v1225_v18  ;;  %v1191_v21 = vadd.f32 %v2341_v5, %v1129_v20 }
 0x2a2   :  { %v1766_v22 = vpop.eup %1765  ;;  %1771 = vtanh.f32 %v1222_v19 }
 0x2a3   :  { %v1223_v23 = vmul.f32 0.5, %v1191_v21 }
 0x2a5   :  { %1773 = vtanh.f32 %v1223_v23 }
 0x2a8   :  { %v1144_v24 = vpop.xlane.xlu0 %1143 }
 0x2a9   :  { %v1196_v25 = vadd.f32 %v2341_v5, %v1144_v24 }
 0x2aa   :  { %v1768_v26 = vpop.eup %1767 }
 0x2ab   :  { %v1228_v27 = vmul.f32 0.5, %v1196_v25 }
 0x2ac   :  { %v1147_v28 = vpop.xlane.xlu1 %1146  ;;  %v1138_v29 = vpop.xlane.xlu0 %1137 }
 0x2ad   :  { %1775 = vtanh.f32 %v1228_v27  ;;  %v1197_v30 = vadd.f32 %v2341_v5, %v1147_v28  ;;  %v1194_v31 = vadd.f32 %v2341_v5, %v1138_v29 }
 0x2ae   :  { %v1770_v33 = vpop.eup %1769 }
 0x2af   :  { %v1772_v34 = vpop.eup %1771  ;;  %v1229_v35 = vmul.f32 0.5, %v1197_v30  ;;  %v1226_v48 = vmul.f32 0.5, %v1194_v31 }
 0x2b0   :  { %v1141_v37 = vpop.xlane.xlu1 %1140 }
 0x2b1   :  { %1777 = vtanh.f32 %v1229_v35  ;;  %v1195_v38 = vadd.f32 %v2341_v5, %v1141_v37 }
 0x2b2   :  { %v1774_v39 = vpop.eup %1773  ;;  %1779 = vtanh.f32 %v1226_v48 }
 0x2b3   :  { %v1227_v40 = vmul.f32 0.5, %v1195_v38 }
 0x2b5   :  { %1781 = vtanh.f32 %v1227_v40 }
 0x2b8   :  { %v1156_v41 = vpop.xlane.xlu0 %1155 }
 0x2b9   :  { %v1200_v42 = vadd.f32 %v2341_v5, %v1156_v41 }
 0x2ba   :  { %v1776_v43 = vpop.eup %1775 }
 0x2bb   :  { %v1232_v44 = vmul.f32 0.5, %v1200_v42 }
 0x2bc   :  { %v1159_v45 = vpop.xlane.xlu1 %1158  ;;  %v1150_v46 = vpop.xlane.xlu0 %1149 }
 0x2bd   :  { %1783 = vtanh.f32 %v1232_v44  ;;  %v1201_v47 = vadd.f32 %v2341_v5, %v1159_v45  ;;  %v1198_v49 = vadd.f32 %v2341_v5, %v1150_v46 }
 0x2be   :  { %v1778_v50 = vpop.eup %1777 }
 0x2bf   :  { %v1780_v51 = vpop.eup %1779  ;;  %v1233_v52 = vmul.f32 0.5, %v1201_v47  ;;  %v1230_v53 = vmul.f32 0.5, %v1198_v49 }
 0x2c0   :  { %v1153_v54 = vpop.xlane.xlu1 %1152 }
 0x2c1   :  { %1785 = vtanh.f32 %v1233_v52  ;;  %v1199_v55 = vadd.f32 %v2341_v5, %v1153_v54 }
 0x2c2   :  { %v1782_v56 = vpop.eup %1781  ;;  %1787 = vtanh.f32 %v1230_v53 }
 0x2c3   :  { %v1231_v57 = vmul.f32 0.5, %v1199_v55 }
 0x2c5   :  { %1789 = vtanh.f32 %v1231_v57 }
 0x2ca   :  { %v1784_v58 = vpop.eup %1783  ;;  %v1162_v59 = vpop.xlane.xlu0 %1161 }
 0x2cb   :  { %v1202_v60 = vadd.f32 %v2341_v5, %v1162_v59 }
 0x2cd   :  { %v1234_v61 = vmul.f32 0.5, %v1202_v60 }
 0x2ce   :  { %v1786_v62 = vpop.eup %1785  ;;  %v1165_v63 = vpop.xlane.xlu1 %1164 }
 0x2cf   :  { %v1168_v0 = vpop.xlane.xlu0 %1167  ;;  %v1788_v1 = vpop.eup %1787  ;;  %1791 = vtanh.f32 %v1234_v61  ;;  %v1203_v2 = vadd.f32 %v2341_v5, %v1165_v63 }
 0x2d0   :  { %v1204_v3 = vadd.f32 %v2341_v5, %v1168_v0 }
 0x2d1   :  { %v1235_v4 = vmul.f32 0.5, %v1203_v2 }
 0x2d2   :  { %v1236_v32 = vmul.f32 0.5, %v1204_v3  ;;  %v1790_v6 = vpop.eup %1789  ;;  %v1171_v7 = vpop.xlane.xlu1 %1170 }
 0x2d3   :  { %1793 = vtanh.f32 %v1235_v4  ;;  %v1205_v8 = vadd.f32 %v2341_v5, %v1171_v7 }
 0x2d4   :  { %1795 = vtanh.f32 %v1236_v32 }
 0x2d5   :  { %v1237_v9 = vmul.f32 0.5, %v1205_v8 }
 0x2d7   :  { %1797 = vtanh.f32 %v1237_v9 }
 0x2dc   :  { %v1792_v10 = vpop.eup %1791 }
 0x2e0   :  { %v1794_v11 = vpop.eup %1793 }
 0x2e1   :  { %v1796_v36 = vpop.eup %1795 }
 0x2e4   :  { %v1798_v12 = vpop.eup %1797 }
 0x2e5   :  { %1408 = vsyncpa [#allocation4], 1 }

</bundles_post_ra>
